<compile_context>
chip_gen: v7x
topology: tpu7x:2x2x1
jax: 0.10.0
libtpu: 0.0.40
codegen_flags: <defaults>
</compile_context>

<pallas_src>
import functools

import jax
import jax.numpy as jnp
import numpy as np
from jax.experimental import pallas as pl
from jax.experimental.pallas import tpu as pltpu


def _cdiv(a: int, b: int) -> int:
    return -(-a // b)


def _round_up(x: int, m: int) -> int:
    return ((x + m - 1) // m) * m


def _balanced_tile(n: int, t_max: int, align: int, min_tiles: int = 1):
    """Tile size covering n with < `align` waste per tile side."""
    t_max = max(align, (t_max // align) * align)
    n_tiles = max(min_tiles, _cdiv(n, t_max))
    t = _round_up(_cdiv(n, n_tiles), align)
    return t, _cdiv(n, t)


def _min_distance_loss_kernel(len_ref, pred_ref, lab_ref, out_ref,
                              m_sc, l_sc, acc_sc, *, m_total):
    # len_ref:  [TB, 1]   int32 (phantom rows padded with 0)
    # pred_ref: [3, TB, 1] f32
    # lab_ref:  [3, TB, TM] native dtype (f32/bf16); boundary blocks may hold
    #           undefined data past row B / column M (labels are NOT padded).
    # out_ref:  [TB, 1] f32 per-row softmin-weighted loss
    # scratch m/l/acc: [TB, 1] f32 running min / exp-sum / weighted sum
    j = pl.program_id(1)
    tb = lab_ref.shape[1]
    tm = lab_ref.shape[2]

    @pl.when(j == 0)
    def _init():
        m_sc[...] = jnp.full(m_sc.shape, jnp.inf, dtype=m_sc.dtype)
        l_sc[...] = jnp.zeros(l_sc.shape, dtype=l_sc.dtype)
        acc_sc[...] = jnp.zeros(acc_sc.shape, dtype=acc_sc.dtype)

    # Squared distance accumulated over the 3 coordinates (unrolled -> VPU;
    # contraction depth 3 would waste the MXU).  Start from d0*d0.
    d = pred_ref[0] - lab_ref[0].astype(jnp.float32)       # [TB,1]-[TB,TM]
    sq = d * d
    for c in (1, 2):
        d = pred_ref[c] - lab_ref[c].astype(jnp.float32)
        sq = sq + d * d
    loss = jnp.sqrt(sq)                                     # == norm(p=2, dim=2)

    # One hoisted iota, reused for both masks.
    col = jax.lax.broadcasted_iota(jnp.int32, (tb, tm), 1)
    rem_len = len_ref[...] - j * tm                         # [TB, 1]
    valid = col < rem_len

    # PyTorch parity: in-range masked entries become loss * 1e15 (softmin
    # weight underflows to ~0, same as the reference).  loss*1e15 only
    # overflows if a raw distance exceeds ~3.4e23 (same behavior as PyTorch).
    loss_masked = jnp.where(valid, loss, loss * jnp.float32(1.0e15))

    # Ragged M edge: columns >= M read undefined data (possibly NaN).  Replace
    # with a large *finite* value so (a) they never win the running min and
    # (b) exp(m_new - 1e30) underflows to exactly 0 and 1e30 * 0 == 0, i.e.
    # they contribute exactly nothing to l / acc.  Only emitted when the tile
    # grid actually overhangs M (static condition).
    if m_total % tm != 0:
        in_m = col < (m_total - j * tm)
        loss_masked = jnp.where(in_m, loss_masked, jnp.float32(1.0e30))

    # Online softmin accumulation across M tiles (numerically stable).
    m_prev = m_sc[...]                                      # [TB, 1]
    tile_min = jnp.min(loss_masked, axis=1, keepdims=True)
    m_new = jnp.minimum(m_prev, tile_min)
    alpha = jnp.exp(m_new - m_prev)                         # rescale old accumulators
    p = jnp.exp(m_new - loss_masked)                        # unnormalized softmin weights
    l_sc[...] = alpha * l_sc[...] + jnp.sum(p, axis=1, keepdims=True)
    acc_sc[...] = alpha * acc_sc[...] + jnp.sum(loss_masked * p, axis=1,
                                                keepdims=True)
    m_sc[...] = m_new

    @pl.when(j == pl.num_programs(1) - 1)
    def _finalize():
        l = l_sc[...]
        inv = pl.reciprocal(l, approx=True)                 # EUP slot (otherwise idle)
        inv = inv * (jnp.float32(2.0) - l * inv)            # one Newton step -> full f32
        out_ref[...] = acc_sc[...] * inv


def min_distance_loss(predictions, labels, lengths, *,
                      labels_coord_major=False, tb_max=256, tm_max=2048):
    """predictions: [B, 3], labels: [B, M, 3] (or [3, B, M] if
    labels_coord_major=True), lengths: [B] -> scalar f32 loss."""
    if labels_coord_major:
        _, B, M = labels.shape
        lab_t = labels                                      # already [3, B, M]
    else:
        B, M, _ = labels.shape
        # TODO(synk): provide labels pre-laid-out as [3, B, M] upstream
        # (labels_coord_major=True); this transpose is the only remaining
        # extra HBM pass over the dominant tensor (no astype, no pad).
        lab_t = jnp.transpose(labels, (2, 0, 1))            # [3, B, M], native dtype

    # bf16 labels pack 2 rows per sublane -> keep TB a multiple of 16.
    sub_align = 16 if jnp.dtype(lab_t.dtype).itemsize < 4 else 8

    # >=2 tiles on the "parallel" B axis when B allows, so both v7x
    # TensorCores get work (no effect on single-TC v5e/v6e).
    min_b_tiles = 2 if B >= 2 * sub_align else 1
    tb, n_b = _balanced_tile(B, tb_max, sub_align, min_b_tiles)
    tm, n_m = _balanced_tile(M, tm_max, 128)
    Bp = n_b * tb

    # Small per-row tensors: cast/transpose/pad is negligible (O(B) bytes).
    pred_t = jnp.transpose(predictions.astype(jnp.float32), (1, 0))[:, :, None]
    pred_t = jnp.pad(pred_t, ((0, 0), (0, Bp - B), (0, 0)))           # [3, Bp, 1]
    lens2 = jnp.pad(lengths.astype(jnp.int32), (0, Bp - B))[:, None]  # [Bp, 1]

    kernel = functools.partial(_min_distance_loss_kernel, m_total=M)

    per_row = pl.pallas_call(
        kernel,
        out_shape=jax.ShapeDtypeStruct((Bp, 1), jnp.float32),
        grid_spec=pltpu.PrefetchScalarGridSpec(
            num_scalar_prefetch=0,
            grid=(n_b, n_m),
            in_specs=[
                pl.BlockSpec((tb, 1), lambda i, j: (i, 0)),          # lengths
                pl.BlockSpec((3, tb, 1), lambda i, j: (0, i, 0)),    # predictions
                pl.BlockSpec((3, tb, tm), lambda i, j: (0, i, j)),   # labels (unpadded)
            ],
            out_specs=pl.BlockSpec((tb, 1), lambda i, j: (i, 0)),
            scratch_shapes=[
                pltpu.VMEM((tb, 1), jnp.float32),   # running min  m_i
                pltpu.VMEM((tb, 1), jnp.float32),   # exp-sum      l_i
                pltpu.VMEM((tb, 1), jnp.float32),   # weighted sum acc
            ],
        ),
        compiler_params=pltpu.CompilerParams(
            dimension_semantics=("parallel", "arbitrary"),
            vmem_limit_bytes=32 * 1024 * 1024,
        ),
    )(lens2, pred_t, lab_t)

    # Rows >= B are phantom (garbage boundary-block reads -> possibly NaN) and
    # are sliced off before the mean.  Rows with lengths==0 give ~1e15*min_dist
    # by design (matches the PyTorch masking semantics).
    return jnp.mean(per_row[:B, 0])


def _reference_loss(predictions, labels, lengths):
    # Pure-JAX reference mirroring the PyTorch forward (assumes M == max(lengths)).
    B, M, _ = labels.shape
    col = jnp.arange(M)[None, :]
    mask = jnp.where(col < lengths[:, None], 1.0, 1.0e15).astype(jnp.float32)
    loss = jnp.sqrt(jnp.sum((predictions[:, None, :] - labels) ** 2, axis=2))
    loss_masked = loss * mask
    softmined = jax.nn.softmax(-loss_masked, axis=1)
    return (loss_masked * softmined).sum(-1).mean()


if __name__ == "__main__":
    key = jax.random.PRNGKey(0)
    k1, k2, k3, k4, k5, k6 = jax.random.split(key, 6)

    # Case 1: small single-tile grid with a ragged M edge (M=24 < tm=128).
    B1, M1 = 8, 24
    pred1 = jax.random.normal(k1, (B1, 3), dtype=jnp.float32)
    lab1 = jax.random.normal(k2, (B1, M1, 3), dtype=jnp.float32)
    len1 = jnp.array([3, 24, 1, 10, 24, 7, 16, 5], dtype=jnp.int32)  # max == M1
    out1 = jax.block_until_ready(min_distance_loss(pred1, lab1, len1))
    ref1 = _reference_loss(pred1, lab1, len1)
    np.testing.assert_allclose(np.asarray(out1), np.asarray(ref1),
                               rtol=1e-4, atol=1e-5)

    # Case 2: multi-tile grid (forced small tiles) with ragged B (20 rows over
    # 3x8-row tiles) and ragged M (300 cols over 3x128-col tiles) edges, and
    # the online-softmin accumulator running across M tiles.
    B2, M2 = 20, 300
    pred2 = jax.random.normal(k3, (B2, 3), dtype=jnp.float32)
    lab2 = jax.random.normal(k4, (B2, M2, 3), dtype=jnp.float32)
    len2 = jnp.concatenate([
        jnp.full((1,), M2, dtype=jnp.int32),          # ensure max(lengths) == M2
        jax.random.randint(jax.random.PRNGKey(1), (B2 - 1,), 1, M2 + 1,
                           dtype=jnp.int32),
    ])
    out2 = jax.block_until_ready(
        min_distance_loss(pred2, lab2, len2, tb_max=8, tm_max=128))
    ref2 = _reference_loss(pred2, lab2, len2)
    np.testing.assert_allclose(np.asarray(out2), np.asarray(ref2),
                               rtol=1e-4, atol=1e-5)

    # Case 3: bf16 labels streamed at native precision (upcast on the VMEM
    # tile inside the kernel; TB kept a multiple of 16).
    B3, M3 = 16, 200
    pred3 = jax.random.normal(k5, (B3, 3), dtype=jnp.float32)
    lab3 = jax.random.normal(k6, (B3, M3, 3), dtype=jnp.float32).astype(jnp.bfloat16)
    len3 = jnp.concatenate([
        jnp.full((1,), M3, dtype=jnp.int32),
        jax.random.randint(jax.random.PRNGKey(2), (B3 - 1,), 1, M3 + 1,
                           dtype=jnp.int32),
    ])
    out3 = jax.block_until_ready(
        min_distance_loss(pred3, lab3, len3, tb_max=32, tm_max=128))
    ref3 = _reference_loss(pred3, lab3.astype(jnp.float32), len3)
    np.testing.assert_allclose(np.asarray(out3), np.asarray(ref3),
                               rtol=2e-4, atol=1e-5)

    print("KERNEL_OK")
</pallas_src>

<mosaic_0001>
module attributes {stable_mosaic.version = 11 : i64} {
  func.func @_min_distance_loss_kernel(%arg0: i32, %arg1: i32, %arg2: memref<8x1xi32, #tpu.memory_space<vmem>>, %arg3: memref<3x8x1xf32, #tpu.memory_space<vmem>>, %arg4: memref<3x8x128xf32, #tpu.memory_space<vmem>>, %arg5: memref<8x1xf32, #tpu.memory_space<vmem>>, %arg6: memref<8x1xf32, #tpu.memory_space<vmem>>, %arg7: memref<8x1xf32, #tpu.memory_space<vmem>>, %arg8: memref<8x1xf32, #tpu.memory_space<vmem>>) attributes {dimension_semantics = [#tpu.dimension_semantics<parallel>, #tpu.dimension_semantics<arbitrary>], iteration_bounds = array<i64: 1, 1>, scalar_prefetch = 0 : i64, scratch_operands = 3 : i64, tpu.core_type = #tpu.core_type<tc>, window_params = [{transform_indices = @transform_0, window_bounds = array<i64: 8, 1>}, {transform_indices = @transform_1, window_bounds = array<i64: 3, 8, 1>}, {transform_indices = @transform_2, window_bounds = array<i64: 3, 8, 128>}, {transform_indices = @transform_3, window_bounds = array<i64: 8, 1>}]} {
    %c0_i32 = arith.constant 0 : i32
    %0 = arith.cmpi eq, %arg1, %c0_i32 : i32
    %1 = arith.extui %0 : i1 to i32
    %c0_i32_0 = arith.constant 0 : i32
    %2 = arith.cmpi ne, %1, %c0_i32_0 : i32
    scf.if %2 {
      %cst_37 = arith.constant 0x7F800000 : f32
      %69 = vector.broadcast %cst_37 : f32 to vector<8x1xf32>
      %c0_38 = arith.constant 0 : index
      %c0_39 = arith.constant 0 : index
      %70 = vector.load %arg6[%c0_38, %c0_39] : memref<8x1xf32, #tpu.memory_space<vmem>>, vector<8x1xf32>
      tpu.vector_store %arg6[%c0_38, %c0_39], %69 {strides = array<i32>} : memref<8x1xf32, #tpu.memory_space<vmem>>, vector<8x1xf32>,
      %cst_40 = arith.constant 0.000000e+00 : f32
      %71 = vector.broadcast %cst_40 : f32 to vector<8x1xf32>
      %c0_41 = arith.constant 0 : index
      %c0_42 = arith.constant 0 : index
      %72 = vector.load %arg7[%c0_41, %c0_42] : memref<8x1xf32, #tpu.memory_space<vmem>>, vector<8x1xf32>
      tpu.vector_store %arg7[%c0_41, %c0_42], %71 {strides = array<i32>} : memref<8x1xf32, #tpu.memory_space<vmem>>, vector<8x1xf32>,
      %cst_43 = arith.constant 0.000000e+00 : f32
      %73 = vector.broadcast %cst_43 : f32 to vector<8x1xf32>
      %c0_44 = arith.constant 0 : index
      %c0_45 = arith.constant 0 : index
      %74 = vector.load %arg8[%c0_44, %c0_45] : memref<8x1xf32, #tpu.memory_space<vmem>>, vector<8x1xf32>
      tpu.vector_store %arg8[%c0_44, %c0_45], %73 {strides = array<i32>} : memref<8x1xf32, #tpu.memory_space<vmem>>, vector<8x1xf32>,
    } else {
    }
    %c0 = arith.constant 0 : index
    %c0_1 = arith.constant 0 : index
    %c0_2 = arith.constant 0 : index
    %3 = vector.load %arg3[%c0, %c0_1, %c0_2] : memref<3x8x1xf32, #tpu.memory_space<vmem>>, vector<1x8x1xf32>
    %4 = vector.shape_cast %3 : vector<1x8x1xf32> to vector<8x1xf32>
    %c0_3 = arith.constant 0 : index
    %c0_4 = arith.constant 0 : index
    %c0_5 = arith.constant 0 : index
    %5 = vector.load %arg4[%c0_3, %c0_4, %c0_5] : memref<3x8x128xf32, #tpu.memory_space<vmem>>, vector<1x8x128xf32>
    %6 = vector.shape_cast %5 : vector<1x8x128xf32> to vector<8x128xf32>
    %7 = vector.broadcast %4 : vector<8x1xf32> to vector<8x128xf32>
    %8 = arith.subf %7, %6 : vector<8x128xf32>
    %9 = arith.mulf %8, %8 : vector<8x128xf32>
    %c1 = arith.constant 1 : index
    %c0_6 = arith.constant 0 : index
    %c0_7 = arith.constant 0 : index
    %10 = vector.load %arg3[%c1, %c0_6, %c0_7] : memref<3x8x1xf32, #tpu.memory_space<vmem>>, vector<1x8x1xf32>
    %11 = vector.shape_cast %10 : vector<1x8x1xf32> to vector<8x1xf32>
    %c1_8 = arith.constant 1 : index
    %c0_9 = arith.constant 0 : index
    %c0_10 = arith.constant 0 : index
    %12 = vector.load %arg4[%c1_8, %c0_9, %c0_10] : memref<3x8x128xf32, #tpu.memory_space<vmem>>, vector<1x8x128xf32>
    %13 = vector.shape_cast %12 : vector<1x8x128xf32> to vector<8x128xf32>
    %14 = vector.broadcast %11 : vector<8x1xf32> to vector<8x128xf32>
    %15 = arith.subf %14, %13 : vector<8x128xf32>
    %16 = arith.mulf %15, %15 : vector<8x128xf32>
    %17 = arith.addf %9, %16 : vector<8x128xf32>
    %c2 = arith.constant 2 : index
    %c0_11 = arith.constant 0 : index
    %c0_12 = arith.constant 0 : index
    %18 = vector.load %arg3[%c2, %c0_11, %c0_12] : memref<3x8x1xf32, #tpu.memory_space<vmem>>, vector<1x8x1xf32>
    %19 = vector.shape_cast %18 : vector<1x8x1xf32> to vector<8x1xf32>
    %c2_13 = arith.constant 2 : index
    %c0_14 = arith.constant 0 : index
    %c0_15 = arith.constant 0 : index
    %20 = vector.load %arg4[%c2_13, %c0_14, %c0_15] : memref<3x8x128xf32, #tpu.memory_space<vmem>>, vector<1x8x128xf32>
    %21 = vector.shape_cast %20 : vector<1x8x128xf32> to vector<8x128xf32>
    %22 = vector.broadcast %19 : vector<8x1xf32> to vector<8x128xf32>
    %23 = arith.subf %22, %21 : vector<8x128xf32>
    %24 = arith.mulf %23, %23 : vector<8x128xf32>
    %25 = arith.addf %17, %24 : vector<8x128xf32>
    %26 = math.sqrt %25 : vector<8x128xf32>
    %27 = tpu.iota {dimensions = array<i32: 1>} : vector<8x128xi32>
    %c0_16 = arith.constant 0 : index
    %c0_17 = arith.constant 0 : index
    %28 = vector.load %arg2[%c0_16, %c0_17] : memref<8x1xi32, #tpu.memory_space<vmem>>, vector<8x1xi32>
    %c128_i32 = arith.constant 128 : i32
    %29 = arith.muli %arg1, %c128_i32 : i32
    %30 = vector.broadcast %29 : i32 to vector<8x1xi32>
    %31 = arith.subi %28, %30 : vector<8x1xi32>
    %32 = vector.broadcast %31 : vector<8x1xi32> to vector<8x128xi32>
    %33 = arith.cmpi slt, %27, %32 : vector<8x128xi32>
    %cst = arith.constant 9.99999986E+14 : f32
    %34 = vector.broadcast %cst : f32 to vector<8x128xf32>
    %35 = arith.mulf %26, %34 : vector<8x128xf32>
    %36 = arith.select %33, %26, %35 : vector<8x128xi1>, vector<8x128xf32>
    %c128_i32_18 = arith.constant 128 : i32
    %37 = arith.muli %arg1, %c128_i32_18 : i32
    %c24_i32 = arith.constant 24 : i32
    %38 = arith.subi %c24_i32, %37 : i32
    %39 = vector.broadcast %38 : i32 to vector<8x128xi32>
    %40 = arith.cmpi slt, %27, %39 : vector<8x128xi32>
    %cst_19 = arith.constant 1.000000e+30 : f32
    %41 = vector.broadcast %cst_19 : f32 to vector<8x128xf32>
    %42 = arith.select %40, %36, %41 : vector<8x128xi1>, vector<8x128xf32>
    %c0_20 = arith.constant 0 : index
    %c0_21 = arith.constant 0 : index
    %43 = vector.load %arg6[%c0_20, %c0_21] : memref<8x1xf32, #tpu.memory_space<vmem>>, vector<8x1xf32>
    %cst_22 = arith.constant dense<0x7F800000> : vector<8xf32>
    %44 = vector.multi_reduction <minimumf>, %42, %cst_22 [1] : vector<8x128xf32> to vector<8xf32>
    %45 = vector.shape_cast %44 : vector<8xf32> to vector<8x1xf32>
    %46 = arith.minimumf %43, %45 : vector<8x1xf32>
    %47 = arith.subf %46, %43 : vector<8x1xf32>
    %48 = math.exp %47 : vector<8x1xf32>
    %49 = vector.broadcast %46 : vector<8x1xf32> to vector<8x128xf32>
    %50 = arith.subf %49, %42 : vector<8x128xf32>
    %51 = math.exp %50 : vector<8x128xf32>
    %c0_23 = arith.constant 0 : index
    %c0_24 = arith.constant 0 : index
    %52 = vector.load %arg7[%c0_23, %c0_24] : memref<8x1xf32, #tpu.memory_space<vmem>>, vector<8x1xf32>
    %53 = arith.mulf %48, %52 : vector<8x1xf32>
    %cst_25 = arith.constant dense<0.000000e+00> : vector<8xf32>
    %54 = vector.multi_reduction <add>, %51, %cst_25 [1] : vector<8x128xf32> to vector<8xf32>
    %55 = vector.shape_cast %54 : vector<8xf32> to vector<8x1xf32>
    %56 = arith.addf %53, %55 : vector<8x1xf32>
    %c0_26 = arith.constant 0 : index
    %c0_27 = arith.constant 0 : index
    %57 = vector.load %arg7[%c0_26, %c0_27] : memref<8x1xf32, #tpu.memory_space<vmem>>, vector<8x1xf32>
    tpu.vector_store %arg7[%c0_26, %c0_27], %56 {strides = array<i32>} : memref<8x1xf32, #tpu.memory_space<vmem>>, vector<8x1xf32>,
    %c0_28 = arith.constant 0 : index
    %c0_29 = arith.constant 0 : index
    %58 = vector.load %arg8[%c0_28, %c0_29] : memref<8x1xf32, #tpu.memory_space<vmem>>, vector<8x1xf32>
    %59 = arith.mulf %48, %58 : vector<8x1xf32>
    %60 = arith.mulf %42, %51 : vector<8x128xf32>
    %cst_30 = arith.constant dense<0.000000e+00> : vector<8xf32>
    %61 = vector.multi_reduction <add>, %60, %cst_30 [1] : vector<8x128xf32> to vector<8xf32>
    %62 = vector.shape_cast %61 : vector<8xf32> to vector<8x1xf32>
    %63 = arith.addf %59, %62 : vector<8x1xf32>
    %c0_31 = arith.constant 0 : index
    %c0_32 = arith.constant 0 : index
    %64 = vector.load %arg8[%c0_31, %c0_32] : memref<8x1xf32, #tpu.memory_space<vmem>>, vector<8x1xf32>
    tpu.vector_store %arg8[%c0_31, %c0_32], %63 {strides = array<i32>} : memref<8x1xf32, #tpu.memory_space<vmem>>, vector<8x1xf32>,
    %c0_33 = arith.constant 0 : index
    %c0_34 = arith.constant 0 : index
    %65 = vector.load %arg6[%c0_33, %c0_34] : memref<8x1xf32, #tpu.memory_space<vmem>>, vector<8x1xf32>
    tpu.vector_store %arg6[%c0_33, %c0_34], %46 {strides = array<i32>} : memref<8x1xf32, #tpu.memory_space<vmem>>, vector<8x1xf32>,
    %c0_i32_35 = arith.constant 0 : i32
    %66 = arith.cmpi eq, %arg1, %c0_i32_35 : i32
    %67 = arith.extui %66 : i1 to i32
    %c0_i32_36 = arith.constant 0 : i32
    %68 = arith.cmpi ne, %67, %c0_i32_36 : i32
    scf.if %68 {
      %c0_37 = arith.constant 0 : index
      %c0_38 = arith.constant 0 : index
      %69 = vector.load %arg7[%c0_37, %c0_38] : memref<8x1xf32, #tpu.memory_space<vmem>>, vector<8x1xf32>
      %70 = tpu.reciprocal %69 {approx = true} : vector<8x1xf32> -> vector<8x1xf32>
      %71 = arith.mulf %69, %70 : vector<8x1xf32>
      %cst_39 = arith.constant 2.000000e+00 : f32
      %72 = vector.broadcast %cst_39 : f32 to vector<8x1xf32>
      %73 = arith.subf %72, %71 : vector<8x1xf32>
      %74 = arith.mulf %70, %73 : vector<8x1xf32>
      %c0_40 = arith.constant 0 : index
      %c0_41 = arith.constant 0 : index
      %75 = vector.load %arg8[%c0_40, %c0_41] : memref<8x1xf32, #tpu.memory_space<vmem>>, vector<8x1xf32>
      %76 = arith.mulf %75, %74 : vector<8x1xf32>
      %c0_42 = arith.constant 0 : index
      %c0_43 = arith.constant 0 : index
      %77 = vector.load %arg5[%c0_42, %c0_43] : memref<8x1xf32, #tpu.memory_space<vmem>>, vector<8x1xf32>
      tpu.vector_store %arg5[%c0_42, %c0_43], %76 {strides = array<i32>} : memref<8x1xf32, #tpu.memory_space<vmem>>, vector<8x1xf32>,
    } else {
    }
    return
  }
  func.func @transform_0(%arg0: i32, %arg1: i32) -> (i32, i32) {
    %c0_i32 = arith.constant 0 : i32
    %c0_i32_0 = arith.constant 0 : i32
    return %arg0, %c0_i32 : i32, i32
  }
  func.func @transform_1(%arg0: i32, %arg1: i32) -> (i32, i32, i32) {
    %c0_i32 = arith.constant 0 : i32
    %c0_i32_0 = arith.constant 0 : i32
    %c0_i32_1 = arith.constant 0 : i32
    return %c0_i32, %arg0, %c0_i32_0 : i32, i32, i32
  }
  func.func @transform_2(%arg0: i32, %arg1: i32) -> (i32, i32, i32) {
    %c0_i32 = arith.constant 0 : i32
    %c0_i32_0 = arith.constant 0 : i32
    return %c0_i32, %arg0, %arg1 : i32, i32, i32
  }
  func.func @transform_3(%arg0: i32, %arg1: i32) -> (i32, i32) {
    %c0_i32 = arith.constant 0 : i32
    %c0_i32_0 = arith.constant 0 : i32
    return %arg0, %c0_i32 : i32, i32
  }
}

</mosaic_0001>

<bundles_post_ra>
// kernel: tpu_custom_call.1
= control target key start
LH: loop header
LB: loop body
LE: loop exit
PB: predicated region body
PF: predicated region fallthrough
CT: control target
= control target key end

     0   :  { %v140_v0 = vmov 0   ;;  %vm18_vm0 = vcmask 7168   ;;  %v141_v5 = vmov inf   ;;  %v62_v20 = vlaneseq  ;;  %s194_s1 = inlined_call_operand.vmem [shape: f32[3,8,1], index: 1, kind: input, shape index: {}]   ;;  %s195_s0 = inlined_call_operand.vmem [shape: s32[8,1], index: 0, kind: input, shape index: {}]   ;;  %s196_s2 = inlined_call_operand.vmem [shape: f32[3,8,24], index: 2, kind: input, shape index: {}]   ;;  %s197_s3 = inlined_call_operand.vmem [shape: f32[8,1], index: 3, kind: output, shape index: {}]  }
   0x1   :  { %130 = vset.pattern.permute.xlu0 %v140_v0  ;;  %v22_v1 = vld [vmem:[%s194_s1] sm:$0xff]  ;;  %131 = vset.pattern.permute.xlu1 %v140_v0  ;;  %v125_v2 = vld [vmem:[%s194_s1 + $0x10] sm:$0xff]  ;;  %v123_v3 = vld [vmem:[%s194_s1 + $0x8] sm:$0xff]  ;;  %19 = vst.msk [vmem:[#allocation2] sm:$0xff] %vm18_vm0, %v141_v5  ;;  %v142_v31 = vmov 0.0  }
   0x2   :  { %26 = vperm.xlu0 %130, %v22_v1   ;;  %49 = vperm.xlu1 %131, %v125_v2   ;;  %v64_v4 = vld [vmem:[%s195_s0] sm:$0xff]  ;;  %v126_v8 = vld [vmem:[%s196_s2 + $0x10] sm:$0xff]  ;;  %v124_v10 = vld [vmem:[%s196_s2 + $0x8] sm:$0xff]  ;;  %v63_v23 = vand.u32 127, %v62_v20  ;;  %20 = vst.msk [vmem:[#allocation3] sm:$0xff] %vm18_vm0, %v142_v31 }
   0x3   :  { %v23_v6 = vld [vmem:[%s196_s2] sm:$0xff]  ;;  %21 = vst.msk [vmem:[#allocation4] sm:$0xff] %vm18_vm0, %v142_v31 }
   0x4   :  { %vm76_vm3 = vcmp.lt.s32.totalorder %v63_v23, 24 }
   0x6   :  { %37 = vperm.xlu0 %130, %v123_v3   ;;  %69 = vperm.xlu1 %131, %v64_v4  }
   0x8   :  { %v78_v32 = vld [vmem:[#allocation2] sm:$0xff] }
   0x9   :  { %v93_v43 = vld [vmem:[#allocation3] sm:$0xff] }
   0xa   :  { %v100_v44 = vld [vmem:[#allocation4] sm:$0xff] }
  0x81   :  { %v27_v7 = vpop.permute.xlu0 %26  ;;  %v50_v9 = vpop.permute.xlu1 %49 }
  0x82   :  { %v29_v11 = vsub.f32 %v27_v7, %v23_v6  ;;  %v52_v12 = vsub.f32 %v50_v9, %v126_v8 }
  0x84   :  { %v30_v15 = vmul.f32 %v29_v11, %v29_v11  ;;  %v53_v16 = vmul.f32 %v52_v12, %v52_v12 }
  0x85   :  { %v38_v13 = vpop.permute.xlu0 %37  ;;  %v70_v25 = vpop.permute.xlu1 %69 }
  0x86   :  { %v40_v14 = vsub.f32 %v38_v13, %v124_v10  ;;  %vm71_vm4 = vcmp.lt.s32.totalorder %v63_v23, %v70_v25 }
  0x88   :  { %v41_v17 = vmul.f32 %v40_v14, %v40_v14 }
  0x8a   :  { %v42_v18 = vadd.f32 %v41_v17, %v30_v15 }
  0x8c   :  { %v54_v19 = vadd.f32 %v53_v16, %v42_v18 }
  0x8e   :  { %132 = vrsqrt.f32 %v54_v19  ;;  %vm57_vm1 = vcmp.eq.f32.partialorder %v54_v19, inf  ;;  %v60_v24 = vand.u32 2147483648, %v54_v19  ;;  %vm59_vm2 = vcmp.eq.f32.partialorder %v54_v19, 0.0 }
  0x98   :  { %v133_v21 = vpop.eup %132 }
  0x99   :  { %v56_v22 = vmul.f32 %v133_v21, %v54_v19 }
  0x9b   :  { %v58_v26 = vsel %vm57_vm1, %v54_v19, %v56_v22 }
  0x9c   :  { %v61_v27 = vsel %vm59_vm2, %v60_v24, %v58_v26 }
  0x9d   :  { %v72_v28 = vmul.f32 1e+15, %v61_v27 }
  0x9f   :  { %v73_v29 = vsel %vm71_vm4, %v61_v27, %v72_v28 }
  0xa0   :  { %v77_v30 = vsel %vm76_vm3, %v73_v29, 1e+30 }
  0xa1   :  { %79 = vmin.xlane.f32.xlu0 %v77_v30 }
 0x12e   :  { %v80_v33 = vpop.xlane.xlu0 %79 }
 0x12f   :  { %v81_v34 = vmin.f32 %v78_v32, %v80_v33 }
 0x131   :  { %v82_v35 = vsub.f32 %v81_v34, %v78_v32  ;;  %107 = vst.msk [vmem:[#allocation2] sm:$0xff] %vm18_vm0, %v81_v34  ;;  %87 = vperm.xlu1 %131, %v81_v34  }
 0x133   :  { %v83_v41 = vmul.f32 1.442695, %v82_v35 }
 0x1b0   :  { %v88_v36 = vpop.permute.xlu1 %87 }
 0x1b1   :  { %v90_v37 = vsub.f32 %v88_v36, %v77_v30 }
 0x1b3   :  { %v91_v38 = vmul.f32 1.442695, %v90_v37 }
 0x1b5   :  { %134 = vpow2.f32 %v91_v38 }
 0x1b6   :  { %136 = vpow2.f32 %v83_v41 }
 0x1bf   :  { %v135_v39 = vpop.eup %134 }
 0x1c0   :  { %95 = vadd.xlane.f32.xlu1 %v135_v39  ;;  %v102_v40 = vmul.f32 %v135_v39, %v77_v30  ;;  %v137_v42 = vpop.eup %136 }
 0x1c1   :  { %v94_v45 = vmul.f32 %v137_v42, %v93_v43  ;;  %v101_v48 = vmul.f32 %v137_v42, %v100_v44 }
 0x1c2   :  { %103 = vadd.xlane.f32.xlu0 %v102_v40 }
 0x24d   :  { %v96_v46 = vpop.xlane.xlu1 %95 }
 0x24e   :  { %v97_v47 = vadd.f32 %v96_v46, %v94_v45 }
 0x24f   :  { %v104_v49 = vpop.xlane.xlu0 %103 }
 0x250   :  { %99 = vst.msk [vmem:[#allocation3] sm:$0xff] %vm18_vm0, %v97_v47  ;;  %v105_v50 = vadd.f32 %v104_v49, %v101_v48 }
 0x252   :  { %106 = vst.msk [vmem:[#allocation4] sm:$0xff] %vm18_vm0, %v105_v50 }
 0x257   :  { %v111_v51 = vld [vmem:[#allocation3] sm:$0xff] }
 0x258   :  { %138 = vrcp.f32 %v111_v51 }
 0x259   :  { %v116_v56 = vld [vmem:[#allocation4] sm:$0xff] }
 0x262   :  { %v139_v52 = vpop.eup %138 }
 0x263   :  { %v113_v53 = vmul.f32 %v139_v52, %v111_v51 }
 0x265   :  { %v114_v54 = vsub.f32 2.0, %v113_v53 }
 0x267   :  { %v115_v55 = vmul.f32 %v139_v52, %v114_v54 }
 0x269   :  { %v117_v57 = vmul.f32 %v116_v56, %v115_v55 }
 0x26b   :  { %118 = vst.msk [vmem:[%s197_s3] sm:$0xff] %vm18_vm0, %v117_v57 }

</bundles_post_ra>
